<compile_context>
chip_gen: v6e
topology: v6e:2x2x1
jax: 0.10.0
libtpu: 0.0.40
codegen_flags: <defaults>
</compile_context>

<pallas_src>
import functools

import jax
import jax.numpy as jnp
from jax.experimental import pallas as pl
from jax.experimental.pallas import tpu as pltpu


def _cbam_kernel(params_ref, x_ref, w1t_ref, b1_ref, w2t_ref, b2_ref, conv_ref,
                 o_ref, *, B, W, HW, dense_conv):
    """Fused CBAM forward for one block of B samples.

    params_ref : SMEM f32[1]   = [folded eval-BN shift of the spatial conv]
    x_ref/o_ref: VMEM (B, C, HW) lane-dense blocks
    w1t_ref    : VMEM (C, Cr)  = W1^T of the channel MLP
    b1_ref     : VMEM (1, Cr)  = b1
    w2t_ref    : VMEM (Cr, C)  = W2^T
    b2_ref     : VMEM (1, C)   = b2
    conv_ref   : dense path: VMEM (2*HW, HW) banded 7x7-conv matrix (pad mask +
                 BN scale folded); roll path: VMEM (49, 2*B, HW) per-tap weight
                 planes pre-broadcast over the B samples in the pooled slab.
    """
    xf = x_ref[...].astype(jnp.float32)                       # (B, C, HW)

    # ---------------- ChannelGate ----------------
    ch_max = jnp.max(xf, axis=2)                              # (B, C)
    ch_avg = jnp.mean(xf, axis=2)                             # (B, C)

    # Shared MLP, both pool branches, all B samples at once (tiny MXU dots).
    w1t = w1t_ref[...]
    b1 = b1_ref[...]
    h = (jnp.maximum(jnp.dot(ch_avg, w1t, preferred_element_type=jnp.float32) + b1, 0.0)
         + jnp.maximum(jnp.dot(ch_max, w1t, preferred_element_type=jnp.float32) + b1, 0.0))
    att = jnp.dot(h, w2t_ref[...], preferred_element_type=jnp.float32) + 2.0 * b2_ref[...]
    cs = jax.nn.sigmoid(att)                                  # (B, C) channel scale

    # ---------------- SpatialGate: channel pooling of x * cs ----------------
    x1 = xf * cs[:, :, None]                                  # (B, C, HW)
    sp_max = jnp.max(x1, axis=1)                              # (B, HW)
    sp_avg = jnp.mean(x1, axis=1)                             # (B, HW)

    bn_shift = params_ref[0]
    if dense_conv:
        # One MXU matmul replaces the 49-tap shift/accumulate loop (small H*W).
        slab = jnp.concatenate([sp_max, sp_avg], axis=1)      # (B, 2*HW)
        logit = jnp.dot(slab, conv_ref[...],
                        preferred_element_type=jnp.float32) + bn_shift
    else:
        # 7x7 conv in flattened coordinates via lane rolls.  The max/avg maps of
        # all B samples are packed in one (2B, HW) slab, so each tap is a single
        # roll (XLU) + one multiply-add (VPU) on sublane-filled vregs.  The
        # zero-padding / row-wrap garbage is killed by zeroed weight lanes.
        slab = jnp.concatenate([sp_max, sp_avg], axis=0)      # (2B, HW)
        acc0 = jnp.zeros((2 * B, HW), jnp.float32)
        acc1 = jnp.zeros((2 * B, HW), jnp.float32)
        for ky in range(7):
            for kx in range(7):
                t = ky * 7 + kx
                shift = (-((ky - 3) * W + (kx - 3))) % HW
                r = slab if shift == 0 else pltpu.roll(slab, shift, axis=1)
                contrib = conv_ref[t] * r
                if t % 2 == 0:
                    acc0 = acc0 + contrib
                else:
                    acc1 = acc1 + contrib
        acc = acc0 + acc1                                      # (2B, HW)
        logit = acc[:B] + acc[B:] + bn_shift                   # (B, HW)

    s_sp = jax.nn.sigmoid(logit)                               # (B, HW) spatial scale

    # ---------------- final rescale, lane-dense store ----------------
    o_ref[...] = (x1 * s_sp[:, None, :]).astype(o_ref.dtype)


def _conv_weight_matrix(conv_w, bn_scale, H, W):
    """Dense (2*HW, HW) matrix equivalent to the 7x7 'same' conv (zero-pad mask
    and eval-BN scale folded), for logit = concat([sp_max, sp_avg], -1) @ Wmat."""
    HW = H * W
    w_scaled = conv_w[0].astype(jnp.float32) * bn_scale        # (2, 7, 7)
    oy = jnp.arange(H).reshape(H, 1, 1, 1)
    ox = jnp.arange(W).reshape(1, W, 1, 1)
    sy = jnp.arange(H).reshape(1, 1, H, 1)
    sx = jnp.arange(W).reshape(1, 1, 1, W)
    dy = sy - oy                                               # (H, 1, H, 1)
    dx = sx - ox                                               # (1, W, 1, W)
    in_range = (jnp.abs(dy) <= 3) & (jnp.abs(dx) <= 3)         # (H, W, H, W)
    kyi = jnp.clip(dy + 3, 0, 6)
    kxi = jnp.clip(dx + 3, 0, 6)
    taps = w_scaled[:, kyi, kxi]                               # (2, oy, ox, sy, sx)
    wm = jnp.where(in_range[None], taps, 0.0)
    # -> rows indexed by (c, sy, sx), columns by (oy, ox)
    return wm.transpose(0, 3, 4, 1, 2).reshape(2 * HW, HW)


def _conv_weight_planes(conv_w, bn_scale, H, W, B):
    """(49, 2*B, HW) per-tap conv weight planes (BN scale and zero-padding
    validity folded), pre-broadcast over the B samples packed in the slab."""
    HW = H * W
    w_scaled = conv_w[0].astype(jnp.float32) * bn_scale        # (2, 7, 7)
    oy = jnp.arange(H).reshape(1, 1, H, 1)
    ox = jnp.arange(W).reshape(1, 1, 1, W)
    dy = (jnp.arange(7) - 3).reshape(7, 1, 1, 1)
    dx = (jnp.arange(7) - 3).reshape(1, 7, 1, 1)
    valid = ((oy + dy >= 0) & (oy + dy < H) &
             (ox + dx >= 0) & (ox + dx < W)).astype(jnp.float32)   # (7, 7, H, W)
    wconv = (jnp.transpose(w_scaled, (1, 2, 0))[:, :, :, None, None]
             * valid[:, :, None, :, :]).reshape(49, 2, HW)         # [t, c, i]
    wconv = jnp.broadcast_to(wconv[:, :, None, :], (49, 2, B, HW))
    return wconv.reshape(49, 2 * B, HW)


def _vmem_capacity_bytes():
    try:
        return int(pltpu.get_tpu_info().vmem_capacity_bytes)
    except Exception:
        return 64 * 1024 * 1024        # conservative (v7x per-TensorCore VMEM)


def _choose_block_batch(N, C, HW, itemsize, conv_bytes_fn, vmem_budget):
    """Largest divisor-of-N batch block that fits the VMEM budget while keeping
    at least 2 grid steps (so the 'parallel' axis can shard across both TCs)."""
    best = 1
    for cand in range(1, N + 1):
        if N % cand:
            continue
        if N // cand < 2 and N >= 2:
            continue
        need = 4 * cand * C * HW * itemsize      # double-buffered in + out blocks
        need += 2 * cand * C * HW * 4            # f32 body temporaries (xf / x1)
        need += 2 * conv_bytes_fn(cand)          # conv weights (double-buffered)
        if need <= vmem_budget:
            best = max(best, cand)
    return best


def cbam_forward(x, w1, b1, w2, b2, conv_w,
                 bn_gamma, bn_beta, bn_mean, bn_var, eps=1e-5,
                 conv_mode="auto", block_batch=None):
    """CBAM forward (eval-mode BN) via a fused Pallas TPU kernel.

    x: (N, C, H, W); w1: (Cr, C); b1: (Cr,); w2: (C, Cr); b2: (C,);
    conv_w: (1, 2, 7, 7); BN params are scalars (running stats, eval mode).
    conv_mode: "auto" | "dense" | "roll" (dense = one MXU matmul, for small H*W).
    """
    N, C, H, W = x.shape
    HW = H * W
    Cr = w1.shape[0]

    if conv_mode == "auto":
        conv_mode = "dense" if 2 * HW * HW * 4 <= (8 << 20) else "roll"

    # Lane-dense view of x: (N, C, H*W) -- free reshape, contiguous in HBM.
    x_flat = x.reshape(N, C, HW)

    # Fold eval-mode BatchNorm into a scale on the conv weights + additive shift.
    bn_scale = (bn_gamma / jnp.sqrt(bn_var + eps)).astype(jnp.float32)
    bn_shift = (bn_beta - bn_mean * bn_scale).astype(jnp.float32)
    params = jnp.reshape(bn_shift, (1,))                      # -> SMEM

    # Choose the block batch B against the per-core VMEM budget.
    cap = _vmem_capacity_bytes()
    budget = max(16 << 20, min(cap - (16 << 20), 48 << 20))
    itemsize = x.dtype.itemsize
    if conv_mode == "dense":
        conv_bytes_fn = lambda b: 2 * HW * HW * 4
    else:
        conv_bytes_fn = lambda b: 49 * 2 * b * HW * 4
    if block_batch is not None:
        B = block_batch
    else:
        B = _choose_block_batch(N, C, HW, itemsize, conv_bytes_fn, budget)
    if N % B != 0:
        B = 1

    if conv_mode == "dense":
        conv_arr = _conv_weight_matrix(conv_w, bn_scale, H, W)      # (2*HW, HW)
    else:
        conv_arr = _conv_weight_planes(conv_w, bn_scale, H, W, B)   # (49, 2B, HW)
    conv_shape = conv_arr.shape

    w1t = jnp.transpose(w1).astype(jnp.float32)               # (C, Cr)
    b1v = b1.astype(jnp.float32).reshape(1, Cr)
    w2t = jnp.transpose(w2).astype(jnp.float32)               # (Cr, C)
    b2v = b2.astype(jnp.float32).reshape(1, C)

    need = (4 * B * C * HW * itemsize + 2 * B * C * HW * 4
            + 2 * conv_bytes_fn(B) + (1 << 20))
    vmem_limit = int(min(cap, max(32 << 20, need + (8 << 20))))

    kernel = functools.partial(_cbam_kernel, B=B, W=W, HW=HW,
                               dense_conv=(conv_mode == "dense"))
    out_flat = pl.pallas_call(
        kernel,
        out_shape=jax.ShapeDtypeStruct((N, C, HW), x.dtype),
        grid_spec=pltpu.PrefetchScalarGridSpec(
            num_scalar_prefetch=1,                            # params -> SMEM
            grid=(N // B,),
            in_specs=[
                pl.BlockSpec((B, C, HW), lambda n, p: (n, 0, 0)),
                pl.BlockSpec((C, Cr), lambda n, p: (0, 0)),
                pl.BlockSpec((1, Cr), lambda n, p: (0, 0)),
                pl.BlockSpec((Cr, C), lambda n, p: (0, 0)),
                pl.BlockSpec((1, C), lambda n, p: (0, 0)),
                pl.BlockSpec(conv_shape, lambda n, p: (0,) * len(conv_shape)),
            ],
            out_specs=pl.BlockSpec((B, C, HW), lambda n, p: (n, 0, 0)),
        ),
        compiler_params=pltpu.CompilerParams(
            dimension_semantics=("parallel",),
            vmem_limit_bytes=vmem_limit,
        ),
    )(params, x_flat, w1t, b1v, w2t, b2v, conv_arr)
    return out_flat.reshape(N, C, H, W)


def cbam_reference(x, w1, b1, w2, b2, conv_w,
                   bn_gamma, bn_beta, bn_mean, bn_var, eps=1e-5):
    """Pure-JAX reference mirroring the PyTorch CBAM module in eval mode."""
    # ChannelGate (default pool_types=['avg', 'max'])
    avg_pool = jnp.mean(x, axis=(2, 3))                       # (N, C)
    max_pool = jnp.max(x, axis=(2, 3))                        # (N, C)

    def mlp(p):
        h = jax.nn.relu(p @ w1.T + b1)
        return h @ w2.T + b2

    att = mlp(avg_pool) + mlp(max_pool)                       # (N, C)
    x1 = x * jax.nn.sigmoid(att)[:, :, None, None]

    # SpatialGate: ChannelPool -> 7x7 conv (no bias) -> eval BN -> sigmoid gate.
    pooled = jnp.concatenate([jnp.max(x1, axis=1, keepdims=True),
                              jnp.mean(x1, axis=1, keepdims=True)], axis=1)
    y = jax.lax.conv_general_dilated(
        pooled, conv_w, window_strides=(1, 1), padding=[(3, 3), (3, 3)],
        dimension_numbers=("NCHW", "OIHW", "NCHW"))
    y = bn_gamma * (y - bn_mean) / jnp.sqrt(bn_var + eps) + bn_beta
    return x1 * jax.nn.sigmoid(y)


if __name__ == "__main__":
    key = jax.random.PRNGKey(0)
    kx, k1, kb1, k2, kb2, kc = jax.random.split(key, 6)

    # gate_channels must be >= reduction_ratio (default 16) for a valid CBAM MLP.
    N, C, H, W = 4, 32, 16, 16
    reduction_ratio = 16
    Cr = C // reduction_ratio

    x = jax.random.normal(kx, (N, C, H, W), dtype=jnp.float32)

    # ChannelGate MLP: Linear(C, Cr) -> ReLU -> Linear(Cr, C).
    w1 = 0.3 * jax.random.normal(k1, (Cr, C), dtype=jnp.float32)
    b1 = 0.1 * jax.random.normal(kb1, (Cr,), dtype=jnp.float32)
    w2 = 0.3 * jax.random.normal(k2, (C, Cr), dtype=jnp.float32)
    b2 = 0.1 * jax.random.normal(kb2, (C,), dtype=jnp.float32)

    # SpatialGate: Conv2d(2, 1, 7, padding=3, bias=False) + BatchNorm2d(1), eval mode.
    conv_w = 0.1 * jax.random.normal(kc, (1, 2, 7, 7), dtype=jnp.float32)
    bn_gamma = jnp.float32(1.3)
    bn_beta = jnp.float32(-0.2)
    bn_mean = jnp.float32(0.05)     # running_mean
    bn_var = jnp.float32(0.9)       # running_var

    ref = cbam_reference(x, w1, b1, w2, b2, conv_w,
                         bn_gamma, bn_beta, bn_mean, bn_var)

    # Tolerance accounts for possible reduced-precision MXU accumulation of the
    # f32 matmuls vs. the XLA reference (default matmul precision on TPU).
    tol = dict(atol=5e-3, rtol=5e-3)

    # 1) Dense-MXU conv path (the auto choice at this feature-map size).
    out = jax.block_until_ready(
        cbam_forward(x, w1, b1, w2, b2, conv_w,
                     bn_gamma, bn_beta, bn_mean, bn_var))
    assert out.shape == x.shape and out.dtype == x.dtype
    assert jnp.allclose(out, ref, **tol)

    # 2) Roll-based conv path (used for large H*W) -- forced here to validate it.
    out_roll = jax.block_until_ready(
        cbam_forward(x, w1, b1, w2, b2, conv_w,
                     bn_gamma, bn_beta, bn_mean, bn_var, conv_mode="roll"))
    assert jnp.allclose(out_roll, ref, **tol)

    print("KERNEL_OK")
</pallas_src>

<mosaic_0001>
module attributes {stable_mosaic.version = 11 : i64} {
  func.func @_cbam_kernel(%arg0: i32, %arg1: memref<1xf32, #tpu.memory_space<smem>>, %arg2: memref<2x32x256xf32, #tpu.memory_space<vmem>>, %arg3: memref<32x2xf32, #tpu.memory_space<vmem>>, %arg4: memref<1x2xf32, #tpu.memory_space<vmem>>, %arg5: memref<2x32xf32, #tpu.memory_space<vmem>>, %arg6: memref<1x32xf32, #tpu.memory_space<vmem>>, %arg7: memref<512x256xf32, #tpu.memory_space<vmem>>, %arg8: memref<2x32x256xf32, #tpu.memory_space<vmem>>) attributes {dimension_semantics = [#tpu.dimension_semantics<parallel>], iteration_bounds = array<i64: 2>, scalar_prefetch = 1 : i64, scratch_operands = 0 : i64, tpu.core_type = #tpu.core_type<tc>, window_params = [{transform_indices = @transform_0, window_bounds = array<i64: 2, 32, 256>}, {pipeline_mode = #tpu.pipeline_mode<synchronous>, transform_indices = @transform_1, window_bounds = array<i64: 32, 2>}, {pipeline_mode = #tpu.pipeline_mode<synchronous>, transform_indices = @transform_2, window_bounds = array<i64: 1, 2>}, {pipeline_mode = #tpu.pipeline_mode<synchronous>, transform_indices = @transform_3, window_bounds = array<i64: 2, 32>}, {pipeline_mode = #tpu.pipeline_mode<synchronous>, transform_indices = @transform_4, window_bounds = array<i64: 1, 32>}, {pipeline_mode = #tpu.pipeline_mode<synchronous>, transform_indices = @transform_5, window_bounds = array<i64: 512, 256>}, {transform_indices = @transform_6, window_bounds = array<i64: 2, 32, 256>}]} {
    %c0 = arith.constant 0 : index
    %c0_0 = arith.constant 0 : index
    %c0_1 = arith.constant 0 : index
    %0 = vector.load %arg2[%c0, %c0_0, %c0_1] : memref<2x32x256xf32, #tpu.memory_space<vmem>>, vector<2x32x256xf32>
    %cst = arith.constant dense<0xFF800000> : vector<2x32xf32>
    %1 = vector.multi_reduction <maximumf>, %0, %cst [2] : vector<2x32x256xf32> to vector<2x32xf32>
    %cst_2 = arith.constant dense<0.000000e+00> : vector<2x32xf32>
    %2 = vector.multi_reduction <add>, %0, %cst_2 [2] : vector<2x32x256xf32> to vector<2x32xf32>
    %cst_3 = arith.constant 2.560000e+02 : f32
    %3 = vector.broadcast %cst_3 : f32 to vector<2x32xf32>
    %4 = arith.divf %2, %3 : vector<2x32xf32>
    %c0_4 = arith.constant 0 : index
    %c0_5 = arith.constant 0 : index
    %5 = vector.load %arg3[%c0_4, %c0_5] : memref<32x2xf32, #tpu.memory_space<vmem>>, vector<32x2xf32>
    %c0_6 = arith.constant 0 : index
    %c0_7 = arith.constant 0 : index
    %6 = vector.load %arg4[%c0_6, %c0_7] : memref<1x2xf32, #tpu.memory_space<vmem>>, vector<1x2xf32>
    %cst_8 = arith.constant dense<0.000000e+00> : vector<2x2xf32>
    %7 = tpu.matmul %4, %5, %cst_8 {dimension_numbers = #tpu.dot_dimension_numbers<[1], [0], [0], [1], [0, 0, 1, 1], [], []>} : vector<2x32xf32>, vector<32x2xf32>, vector<2x2xf32> -> vector<2x2xf32>
    %8 = vector.broadcast %6 : vector<1x2xf32> to vector<2x2xf32>
    %9 = arith.addf %7, %8 : vector<2x2xf32>
    %cst_9 = arith.constant 0.000000e+00 : f32
    %10 = vector.broadcast %cst_9 : f32 to vector<2x2xf32>
    %11 = arith.maximumf %9, %10 : vector<2x2xf32>
    %cst_10 = arith.constant dense<0.000000e+00> : vector<2x2xf32>
    %12 = tpu.matmul %1, %5, %cst_10 {dimension_numbers = #tpu.dot_dimension_numbers<[1], [0], [0], [1], [0, 0, 1, 1], [], []>} : vector<2x32xf32>, vector<32x2xf32>, vector<2x2xf32> -> vector<2x2xf32>
    %13 = vector.broadcast %6 : vector<1x2xf32> to vector<2x2xf32>
    %14 = arith.addf %12, %13 : vector<2x2xf32>
    %cst_11 = arith.constant 0.000000e+00 : f32
    %15 = vector.broadcast %cst_11 : f32 to vector<2x2xf32>
    %16 = arith.maximumf %14, %15 : vector<2x2xf32>
    %17 = arith.addf %11, %16 : vector<2x2xf32>
    %c0_12 = arith.constant 0 : index
    %c0_13 = arith.constant 0 : index
    %18 = vector.load %arg5[%c0_12, %c0_13] : memref<2x32xf32, #tpu.memory_space<vmem>>, vector<2x32xf32>
    %cst_14 = arith.constant dense<0.000000e+00> : vector<2x32xf32>
    %19 = tpu.matmul %17, %18, %cst_14 {dimension_numbers = #tpu.dot_dimension_numbers<[1], [0], [0], [1], [0, 0, 1, 1], [], []>} : vector<2x2xf32>, vector<2x32xf32>, vector<2x32xf32> -> vector<2x32xf32>
    %c0_15 = arith.constant 0 : index
    %c0_16 = arith.constant 0 : index
    %20 = vector.load %arg6[%c0_15, %c0_16] : memref<1x32xf32, #tpu.memory_space<vmem>>, vector<1x32xf32>
    %cst_17 = arith.constant 2.000000e+00 : f32
    %21 = vector.broadcast %cst_17 : f32 to vector<1x32xf32>
    %22 = arith.mulf %21, %20 : vector<1x32xf32>
    %23 = vector.broadcast %22 : vector<1x32xf32> to vector<2x32xf32>
    %24 = arith.addf %19, %23 : vector<2x32xf32>
    %25 = arith.negf %24 : vector<2x32xf32>
    %26 = math.exp %25 : vector<2x32xf32>
    %cst_18 = arith.constant 1.000000e+00 : f32
    %27 = vector.broadcast %cst_18 : f32 to vector<2x32xf32>
    %28 = arith.addf %27, %26 : vector<2x32xf32>
    %29 = arith.divf %27, %28 : vector<2x32xf32>
    %30 = vector.shape_cast %29 : vector<2x32xf32> to vector<2x32x1xf32>
    %31 = vector.broadcast %30 : vector<2x32x1xf32> to vector<2x32x256xf32>
    %32 = arith.mulf %0, %31 : vector<2x32x256xf32>
    %cst_19 = arith.constant dense<0xFF800000> : vector<2x256xf32>
    %33 = vector.multi_reduction <maximumf>, %32, %cst_19 [1] : vector<2x32x256xf32> to vector<2x256xf32>
    %cst_20 = arith.constant dense<0.000000e+00> : vector<2x256xf32>
    %34 = vector.multi_reduction <add>, %32, %cst_20 [1] : vector<2x32x256xf32> to vector<2x256xf32>
    %cst_21 = arith.constant 3.200000e+01 : f32
    %35 = vector.broadcast %cst_21 : f32 to vector<2x256xf32>
    %36 = arith.divf %34, %35 : vector<2x256xf32>
    %c0_22 = arith.constant 0 : index
    %37 = memref.load %arg1[%c0_22] : memref<1xf32, #tpu.memory_space<smem>>
    %38 = tpu.concatenate %33, %36 in 1 : vector<2x256xf32>, vector<2x256xf32> -> vector<2x512xf32>
    %c0_23 = arith.constant 0 : index
    %c0_24 = arith.constant 0 : index
    %39 = vector.load %arg7[%c0_23, %c0_24] : memref<512x256xf32, #tpu.memory_space<vmem>>, vector<512x256xf32>
    %cst_25 = arith.constant dense<0.000000e+00> : vector<2x256xf32>
    %40 = tpu.matmul %38, %39, %cst_25 {dimension_numbers = #tpu.dot_dimension_numbers<[1], [0], [0], [1], [0, 0, 1, 1], [], []>} : vector<2x512xf32>, vector<512x256xf32>, vector<2x256xf32> -> vector<2x256xf32>
    %41 = vector.broadcast %37 : f32 to vector<2x256xf32>
    %42 = arith.addf %40, %41 : vector<2x256xf32>
    %43 = arith.negf %42 : vector<2x256xf32>
    %44 = math.exp %43 : vector<2x256xf32>
    %cst_26 = arith.constant 1.000000e+00 : f32
    %45 = vector.broadcast %cst_26 : f32 to vector<2x256xf32>
    %46 = arith.addf %45, %44 : vector<2x256xf32>
    %47 = arith.divf %45, %46 : vector<2x256xf32>
    %48 = vector.shape_cast %47 : vector<2x256xf32> to vector<2x1x256xf32>
    %49 = vector.broadcast %48 : vector<2x1x256xf32> to vector<2x32x256xf32>
    %50 = arith.mulf %32, %49 : vector<2x32x256xf32>
    %c0_27 = arith.constant 0 : index
    %c0_28 = arith.constant 0 : index
    %c0_29 = arith.constant 0 : index
    %51 = vector.load %arg8[%c0_27, %c0_28, %c0_29] : memref<2x32x256xf32, #tpu.memory_space<vmem>>, vector<2x32x256xf32>
    tpu.vector_store %arg8[%c0_27, %c0_28, %c0_29], %50 {strides = array<i32>} : memref<2x32x256xf32, #tpu.memory_space<vmem>>, vector<2x32x256xf32>,
    return
  }
  func.func @transform_0(%arg0: i32, %arg1: memref<1xf32, #tpu.memory_space<smem>>) -> (i32, i32, i32) {
    %c0_i32 = arith.constant 0 : i32
    %c0_i32_0 = arith.constant 0 : i32
    %c0_i32_1 = arith.constant 0 : i32
    return %arg0, %c0_i32, %c0_i32_0 : i32, i32, i32
  }
  func.func @transform_1(%arg0: i32, %arg1: memref<1xf32, #tpu.memory_space<smem>>) -> (i32, i32) {
    %c0_i32 = arith.constant 0 : i32
    %c0_i32_0 = arith.constant 0 : i32
    %c0_i32_1 = arith.constant 0 : i32
    return %c0_i32, %c0_i32_0 : i32, i32
  }
  func.func @transform_2(%arg0: i32, %arg1: memref<1xf32, #tpu.memory_space<smem>>) -> (i32, i32) {
    %c0_i32 = arith.constant 0 : i32
    %c0_i32_0 = arith.constant 0 : i32
    %c0_i32_1 = arith.constant 0 : i32
    return %c0_i32, %c0_i32_0 : i32, i32
  }
  func.func @transform_3(%arg0: i32, %arg1: memref<1xf32, #tpu.memory_space<smem>>) -> (i32, i32) {
    %c0_i32 = arith.constant 0 : i32
    %c0_i32_0 = arith.constant 0 : i32
    %c0_i32_1 = arith.constant 0 : i32
    return %c0_i32, %c0_i32_0 : i32, i32
  }
  func.func @transform_4(%arg0: i32, %arg1: memref<1xf32, #tpu.memory_space<smem>>) -> (i32, i32) {
    %c0_i32 = arith.constant 0 : i32
    %c0_i32_0 = arith.constant 0 : i32
    %c0_i32_1 = arith.constant 0 : i32
    return %c0_i32, %c0_i32_0 : i32, i32
  }
  func.func @transform_5(%arg0: i32, %arg1: memref<1xf32, #tpu.memory_space<smem>>) -> (i32, i32) {
    %c0_i32 = arith.constant 0 : i32
    %c0_i32_0 = arith.constant 0 : i32
    %c0_i32_1 = arith.constant 0 : i32
    return %c0_i32, %c0_i32_0 : i32, i32
  }
  func.func @transform_6(%arg0: i32, %arg1: memref<1xf32, #tpu.memory_space<smem>>) -> (i32, i32, i32) {
    %c0_i32 = arith.constant 0 : i32
    %c0_i32_0 = arith.constant 0 : i32
    %c0_i32_1 = arith.constant 0 : i32
    return %arg0, %c0_i32, %c0_i32_0 : i32, i32, i32
  }
}

</mosaic_0001>

<bundles_post_ra>
// kernel: tpu_custom_call.1
= control target key start
LH: loop header
LB: loop body
LE: loop exit
PB: predicated region body
PF: predicated region fallthrough
CT: control target
= control target key end

     0   :  { %s2106_s0 = inlined_call_operand.<no memory space> [shape: f32[1], index: 0, kind: input, shape index: {}]   ;;  %s2107_s1 = inlined_call_operand.hbm [shape: f32[4,32,256], index: 1, kind: input, shape index: {}]   ;;  %s2108_s2 = inlined_call_operand.vmem [shape: f32[32,2], index: 2, kind: input, shape index: {}]   ;;  %s2109_s3 = inlined_call_operand.vmem [shape: f32[1,2], index: 3, kind: input, shape index: {}]   ;;  %s2110_s4 = inlined_call_operand.vmem [shape: f32[2,32], index: 4, kind: input, shape index: {}]   ;;  %s2111_s5 = inlined_call_operand.vmem [shape: f32[1,32], index: 5, kind: input, shape index: {}]   ;;  %s2112_s6 = inlined_call_operand.hbm [shape: f32[512,256], index: 6, kind: input, shape index: {}]   ;;  %s2113_s7 = inlined_call_operand.hbm [shape: f32[4,32,256], index: 7, kind: output, shape index: {}]  }
   0x1   :  { %12 = sst [smem:[#allocation3]] %s2106_s0 }
   0x2   :  { %13 = vsyncpa [#allocation5], 0 }
   0x3   :  { %15 = vsyncpa [#allocation5 + $0x1], 0 }
   0x4   :  { %16 = vsyncpa [#allocation8], 0 }
   0x5   :  { %17 = vsyncpa [#allocation6], 0 }
   0x6   :  { %19 = vsyncpa [#allocation6 + $0x1], 0  ;;  %s1646_s26 = smov 0   ;;  %s1648_s27 = smov 0  }
   0x7   :  { %s1650_s28 = smov 0   ;;  %s1652_s29 = smov 0  }
   0x8 LB: > { %s1667_s0 = sadd.s32 4294967295, %s1591_s29   ;;  %s1324_s30 = sadd.s32 4294967294, %s1591_s29   ;;  %s1591_s29 = sphi %s1652_s29, %s2139_s29   ;;  %s1587_s28 = sphi %s1650_s28, %s2138_s28   ;;  %s1583_s27 = sphi %s1648_s27, %s2137_s27   ;;  %s1579_s26 = sphi %s1646_s26, %s2136_s26  }
   0x9   : > { %p45_p0 = scmp.ne.s32.totalorder %s1583_s27, %s1579_s26  ;;  %p2114_p1 = scmp.eq.s32.totalorder %s1667_s0, 0 }
   0xa   : > { %p180_p3 = scmp.eq.s32.totalorder %s1324_s30, 1  ;;  %p1325_p5 = scmp.ge.s32.totalorder %s1591_s29, 1 }
   0xb   : > { %p1676_p4 = por %p2114_p1, %p45_p0  ;;  %p187_p7 = scmp.lt.s32.totalorder %s1591_s29, 3 }
   0xc   : > { %p1681_p6 = por %p180_p3, %p45_p0  ;;  %s1593_s11 = smov [#allocation7]  }
   0xd   : > { %s2120_s8 = scalar_select %p1676_p4, 1, 0 }
   0xe   : > { %s2121_s9 = scalar_select %p1681_p6, 1, 0 }
   0xf   : > { %p1686_p8 = pnand %p1325_p5, %p187_p7  ;;  %s211_s12 = sshll.u32 %s1593_s11, 4  ;;  %s212_s12 = int_to_ptr.vmem [resolvable:$true] %s211_s12 }
  0x10   : > { %s1700_s14 = sadd.s32 1, %s1591_s29   ;;  %s32_s15 = sadd.s32 1, %s1587_s28 }
  0x11   : > { %s2122_s10 = scalar_select %p1686_p8, 1, 0 }
  0x12   : > { %p1401_p9 = pneg %p1686_p8  ;;  %s29_s16 = ssub.s32 %s1591_s29, %s1700_s14 }
  0x13   : > { %s1480_s17 = scalar_lea.vmem %s212_s12, 16384  ;;  %p1488_p5 = scmp.lt.s32.totalorder %s212_s12, %s212_s12 }
  0x14   : > { %p1695_p11 = pnand %p1401_p9, %p2114_p1  ;;  %p1481_p13 = scmp.ne.s32.totalorder %s212_s12, %s1480_s17 }
  0x15   : > { %p1489_p7 = scmp.lt.s32.totalorder %s1480_s17, %s1480_s17 }
  0x16   : > { %p1471_p12 = pneg %p1695_p11 }
  0x17   : > { %p1490_p10 = por %p1489_p7, %p1488_p5 }
  0x18   : > { %p1483_p0 = pnand %p1481_p13, %p1471_p12 }
  0x1a   : > { %p1484_p3 = pneg %p1483_p0 }
  0x1c   : > { %p1491_p2 = pnand %p1490_p10, %p1484_p3 }
  0x1e   : > { %1494 = shalt.err (!%p1491_p2)
}
  0x1f   : > { %s2115_s18 = smov 256   ;;  %s2116_s19 = smov 16  }
  0x20   : > { %1404 = dma.hbm_to_vmem [thread:$0]  (!%p1695_p11), %s2112_s6, 16384, %s212_s12, [#allocation8], %s2115_s18, %s2115_s18, %s2116_s19  }
  0x21   : > { %p30_p2 = scmp.eq.s32.totalorder %s29_s16, 0  ;;  %p39_p9 = scmp.ne.s32.totalorder %s1587_s28, %s1583_s27 }
  0x22   : > { %p40_p10 = scmp.eq.s32.totalorder %s1591_s29, 0  ;;  %p1414_p12 = scmp.lt.s32.totalorder %s1591_s29, 2 }
  0x23   : > { %s1720_s22 = scalar_select %p30_p2, %s1587_s28, %s32_s15  }
  0x24   : > { %p41_p13 = por %p40_p10, %p39_p9  ;;  %p2124_p0 = scmp.eq.s32.totalorder %s1667_s0, 1 }
  0x25   : > { %s225_s24 = sand.u32 1, %s1587_s28   ;;  %s1351_s25 = sshll.u32 %s1591_s29, 11 }
  0x26   : > { %p1724_p3 = por %p2124_p0, %p39_p9  ;;  %s1328_s30 = sshll.u32 %s225_s24, 7 }
  0x27   : > { %s1733_s17 = scalar_lea.hbm %s2107_s1, %s1351_s25  ;;  %s229_s12 = scalar_lea.vmem [#allocation4], %s1328_s30 }
  0x28   : > { %s2125_s23 = scalar_select %p1724_p3, 1, 0 }
  0x29   : > { %s237_s15 = sshll.u32 %s229_s12, 4  ;;  %p1735_p11 = pnand %p1414_p12, %p41_p13  ;;  %s1739_s15 = int_to_ptr.vmem [resolvable:$true] %s237_s15 }
  0x2a   : > { %s1741_s20 = scalar_lea.sflag [#allocation5], %s225_s24  ;;  %s1495_s21 = scalar_lea.hbm %s1733_s17, 2048 }
  0x2b   : > { %p1496_p5 = scmp.ne.s32.totalorder %s1733_s17, %s1495_s21  ;;  %p1497_p7 = pneg %p1735_p11 }
  0x2c   : > { %s1500_s30 = scalar_lea.hbm %s2107_s1, 4096  ;;  %p1501_p10 = scmp.lt.s32.totalorder %s1733_s17, %s2107_s1 }
  0x2d   : > { %p1498_p2 = pnand %p1497_p7, %p1496_p5  ;;  %p1502_p12 = scmp.lt.s32.totalorder %s1500_s30, %s1495_s21 }
  0x2f   : > { %p1499_p9 = pneg %p1498_p2  ;;  %p1503_p13 = por %p1502_p12, %p1501_p10 }
  0x31   : > { %p1504_p0 = pnand %p1503_p13, %p1499_p9 }
  0x33   : > { %1507 = shalt.err (!%p1504_p0)
}
  0x34   : > { %s1508_s24 = scalar_lea.vmem %s1739_s15, 2048  ;;  %s1596_s18 = smov [#allocation4]  }
  0x35   : > { %p1509_p1 = scmp.ne.s32.totalorder %s1739_s15, %s1508_s24  ;;  %s1513_s19 = sshll.u32 %s1596_s18, 4  ;;  %s1514_s19 = int_to_ptr.vmem [resolvable:$false] %s1513_s19 }
  0x36   : > { %s1515_s25 = scalar_lea.vmem %s1514_s19, 4096  ;;  %p1516_p2 = scmp.lt.s32.totalorder %s1739_s15, %s1514_s19 }
  0x37   : > { %p1511_p6 = pnand %p1509_p1, %p1497_p7  ;;  %p1517_p3 = scmp.lt.s32.totalorder %s1515_s25, %s1508_s24 }
  0x39   : > { %p1512_p5 = pneg %p1511_p6  ;;  %p1518_p4 = por %p1517_p3, %p1516_p2 }
  0x3b   : > { %p1519_p8 = pnand %p1518_p4, %p1512_p5 }
  0x3d   : > { %1522 = shalt.err (!%p1519_p8)
}
  0x3e   : > { %s2127_s21 = smov 16   ;;  %s2128_s11 = smov 256  }
  0x3f   : > { %1408 = dma.hbm_to_vmem [thread:$0]  (!%p1735_p11), %s1733_s17, 2048, %s1739_s15, %s1741_s20, %s2128_s11, %s2128_s11, %s2127_s21  }
  0x40   : > { %p2129_p1 = scmp.ne.s32.totalorder %s2122_s10, 0 }
  0x41   : > { %s1768_s18 = sand.u32 (!%p2129_p1), 1, %s1583_s27   ;;  %p2130_p4 = scmp.ne.s32.totalorder (!%p2129_p1), %s2120_s8, 0 }
  0x42   : > { %249 = sbr.rel (%p2129_p1) target bundleno = 1089 (0x441), region = 44  ;;  %s1333_s19 = sshll.u32 (!%p2129_p1), %s1768_s18, 7 }
  0x43   : > { %s252_s30 = scalar_lea.sflag (!%p2129_p1), [#allocation5], %s1768_s18  ;;  %s1774_s16 = scalar_lea.vmem (!%p2129_p1), [#allocation4], %s1333_s19 }
  0x47   : > { %1566 = dma.done.wait (%p2130_p4), %s252_s30, 2048  }
  0x48   : > { %1568 = vsyncadd (%p2130_p4), %s252_s30, 4294965248  ;;  %p2131_p6 = scmp.eq.s32.totalorder %s1667_s0, 0 }
  0x4a   : > { %1570 = dma.done.wait (%p2131_p6), [#allocation8], 16384   ;;  %p2132_p8 = pmov %p2131_p6 }
  0x4b   : > { %v1785_v0 = vld [vmem:[%s1774_s16 + $0x40] sm:$0xff]  ;;  %v1788_v1 = vld [vmem:[%s1774_s16 + $0x48] sm:$0xff]  ;;  %v1799_v5 = vld [vmem:[%s1774_s16 + $0x50] sm:$0xff]  ;;  %v1597_v32 = vmov 0.0   ;;  %vm1598_vm0 = vmmov 0   ;;  %v382_v40 = vlaneseq  ;;  %vm393_vm1 = vcmask 130112  }
  0x4c   : > { %1572 = vsyncadd (%p2132_p8), [#allocation8], 4294950912  ;;  %v1791_v2 = vld [vmem:[%s1774_s16] sm:$0xff]  ;;  %v342_v3 = vadd.f32 %v1788_v1, %v1785_v0  ;;  %v1796_v4 = vld [vmem:[%s1774_s16 + $0x8] sm:$0xff]  ;;  %v318_v21 = vmax.f32 %v1785_v0, %v1788_v1  ;;  %1366 = vmatprep.subr.mxu0 %v1597_v32  ;;  %1377 = vmatprep.subr.mxu1 %v1597_v32  ;;  %vm400_vm2 = vcmask 195712   ;;  %vm407_vm3 = vcmask 261312  }
  0x4d   : > { %v1802_v6 = vld [vmem:[%s1774_s16 + $0x58] sm:$0xff]  ;;  %v330_v7 = vadd.f32 %v1796_v4, %v1791_v2  ;;  %v1807_v8 = vld [vmem:[%s1774_s16 + $0x10] sm:$0xff]  ;;  %v1817_v12 = vld [vmem:[%s1774_s16 + $0x60] sm:$0xff]  ;;  %v306_v19 = vmax.f32 %v1791_v2, %v1796_v4  ;;  %1374 = vmatprep.mubr.msk.f32.mxu0 %vm1598_vm0, %v1597_v32  ;;  %1385 = vmatprep.mubr.msk.f32.mxu1 %vm1598_vm0, %v1597_v32  ;;  %v383_v43 = vand.u32 127, %v382_v40  ;;  %v1889_v48 = vshrl.u32 %v382_v40, 7  ;;  %s849_s10 = sld [smem:[#allocation3]] }
  0x4e   : > { %v1810_v9 = vld [vmem:[%s1774_s16 + $0x18] sm:$0xff]  ;;  %343 = vadd.xlane.f32.xlu1 %v342_v3  ;;  %v345_v10 = vadd.f32 %v1802_v6, %v1799_v5  ;;  %v1820_v13 = vld [vmem:[%s1774_s16 + $0x68] sm:$0xff]  ;;  %v1823_v14 = vld [vmem:[%s1774_s16 + $0x20] sm:$0xff]  ;;  %v321_v20 = vmax.f32 %v1799_v5, %v1802_v6  ;;  %vm428_vm4 = vcmask 1041409   ;;  %vm430_vm5 = vcmask 261120   ;;  %s1353_s17 = sshll.u32 %s1667_s0, 11 }
  0x4f   : > { %331 = vadd.xlane.f32.xlu0 %v330_v7  ;;  %v333_v11 = vadd.f32 %v1810_v9, %v1807_v8  ;;  %v1826_v15 = vld [vmem:[%s1774_s16 + $0x28] sm:$0xff]  ;;  %v348_v16 = vadd.f32 %v1820_v13, %v1817_v12  ;;  %v309_v18 = vmax.f32 %v1807_v8, %v1810_v9  ;;  %v1841_v22 = vld [vmem:[%s1774_s16 + $0x70] sm:$0xff]  ;;  %v1844_v23 = vld [vmem:[%s1774_s16 + $0x78] sm:$0xff]  ;;  %v324_v28 = vmax.f32 %v1817_v12, %v1820_v13  ;;  %s2025_s15 = scalar_lea.vmem [#allocation9], %s1333_s19  ;;  %s2049_s13 = scalar_lea.hbm %s2113_s7, %s1353_s17 }
  0x50   : > { %v336_v17 = vadd.f32 %v1826_v15, %v1823_v14  ;;  %v1847_v24 = vld [vmem:[%s1774_s16 + $0x30] sm:$0xff]  ;;  %v1850_v25 = vld [vmem:[%s1774_s16 + $0x38] sm:$0xff]  ;;  %v351_v26 = vadd.f32 %v1844_v23, %v1841_v22  ;;  %v312_v29 = vmax.f32 %v1823_v14, %v1826_v15  ;;  %v327_v30 = vmax.f32 %v1841_v22, %v1844_v23  ;;  %v364_v35 = vld [vmem:[%s2108_s2 + $0x8] sm:$0xff]  ;;  %s1241_s20 = sshll.u32 %s2025_s15, 4  ;;  %s1227_s12 = scalar_lea.sflag [#allocation6], %s1768_s18  ;;  %s2051_s20 = int_to_ptr.vmem [resolvable:$true] %s1241_s20 }
  0x51   : > { %v339_v27 = vadd.f32 %v1850_v25, %v1847_v24  ;;  %v315_v31 = vmax.f32 %v1847_v24, %v1850_v25  ;;  %v366_v33 = vld [vmem:[%s2108_s2 + $0x18] sm:$0xff]  ;;  %v365_v34 = vld [vmem:[%s2108_s2 + $0x10] sm:$0xff]  ;;  %v363_v36 = vld [vmem:[%s2108_s2] sm:$0xff]  ;;  %v388_v45 = vadd.s32 4294967288, %v383_v43  ;;  %v395_v46 = vadd.s32 4294967280, %v383_v43  ;;  %s1523_s24 = scalar_lea.vmem %s2051_s20, 2048 }
  0x52   : > { %346 = vadd.xlane.f32.xlu1 %v345_v10  ;;  %1367 = vmatpush3.msra.mxu0 %v366_v33  ;;  %v402_v52 = vadd.s32 4294967272, %v383_v43  ;;  %v386_v57 = vsub.s32 %v383_v43, %v1889_v48  ;;  %vm638_vm6 = vcmask 1041408   ;;  %vm634_vm7 = vcmask 15360   ;;  %p1524_p3 = scmp.ne.s32.totalorder %s2051_s20, %s1523_s24  ;;  %p2133_p11 = scmp.ne.s32.totalorder %s2125_s23, 0 }
  0x53   : > { %334 = vadd.xlane.f32.xlu0 %v333_v11  ;;  %1368 = vmatprep.subr.mxu0 %v1597_v32  ;;  %v391_v50 = vsub.s32 %v388_v45, %v1889_v48  ;;  %v398_v54 = vsub.s32 %v395_v46, %v1889_v48  ;;  %s1600_s25 = smov [#allocation9]  }
  0x54   : > { %1378 = vmatpush3.msra.mxu1 %v366_v33  ;;  %1369 = vmatpush3.msra.mxu0 %v365_v34  ;;  %v405_v63 = vsub.s32 %v402_v52, %v1889_v48  ;;  %p1525_p7 = pnand %p1524_p3, %p2133_p11  ;;  %s1527_s21 = sshll.u32 %s1600_s25, 4  ;;  %s1528_s21 = int_to_ptr.vmem [resolvable:$false] %s1527_s21 }
  0x55   : > { %1379 = vmatprep.subr.mxu1 %v1597_v32  ;;  %1370 = vmatprep.subr.mxu0 %v1597_v32  ;;  %s1529_s11 = scalar_lea.vmem %s1528_s21, 4096  ;;  %p1530_p10 = scmp.lt.s32.totalorder %s2051_s20, %s1528_s21 }
  0x56   : > { %349 = vadd.xlane.f32.xlu1 %v348_v16  ;;  %1380 = vmatpush3.msra.mxu1 %v365_v34  ;;  %p1526_p9 = pneg %p1525_p7  ;;  %p1531_p12 = scmp.lt.s32.totalorder %s1529_s11, %s1523_s24 }
  0x57   : > { %337 = vadd.xlane.f32.xlu0 %v336_v17  ;;  %1371 = vmatpush3.msra.mxu0 %v364_v35 }
  0x58   : > { %1381 = vmatprep.subr.mxu1 %v1597_v32  ;;  %1372 = vmatprep.subr.mxu0 %v1597_v32  ;;  %p1532_p13 = por %p1531_p12, %p1530_p10 }
  0x59   : > { %1382 = vmatpush3.msra.mxu1 %v364_v35  ;;  %1373 = vmatpush3.msra.mxu0 %v363_v36 }
  0x5a   : > { %310 = vmax.xlane.f32.xlu1 %v309_v18  ;;  %1383 = vmatprep.subr.mxu1 %v1597_v32  ;;  %p1533_p0 = pnand %p1532_p13, %p1526_p9 }
  0x5b   : > { %307 = vmax.xlane.f32.xlu0 %v306_v19  ;;  %1384 = vmatpush3.msra.mxu1 %v363_v36 }
  0x5c   : > { %1388 = vmatprep.subr.mxu0 %v1597_v32 }
  0x5e   : > { %322 = vmax.xlane.f32.xlu1 %v321_v20 }
  0x5f   : > { %319 = vmax.xlane.f32.xlu0 %v318_v21 }
  0x62   : > { %352 = vadd.xlane.f32.xlu1 %v351_v26 }
  0x63   : > { %340 = vadd.xlane.f32.xlu0 %v339_v27 }
  0x66   : > { %325 = vmax.xlane.f32.xlu1 %v324_v28 }
  0x67   : > { %313 = vmax.xlane.f32.xlu0 %v312_v29 }
  0x6a   : > { %328 = vmax.xlane.f32.xlu1 %v327_v30 }
  0x6b   : > { %316 = vmax.xlane.f32.xlu0 %v315_v31 }
  0xd7   : > { %v344_v37 = vpop.xlane.xlu1 %343 }
  0xd8   : > { %v332_v38 = vpop.xlane.xlu0 %331  ;;  %v359_v58 = vmul.f32 0.00390625, %v344_v37 }
  0xd9   : > { %v355_v61 = vmul.f32 0.00390625, %v332_v38 }
  0xda   : > { %v412_v11 = vrot.slane %v359_v58, %v386_v57 }
  0xdb   : > { %v347_v39 = vpop.xlane.xlu1 %346  ;;  %v387_v19 = vrot.slane %v355_v61, %v386_v57 }
  0xdc   : > { %v335_v41 = vpop.xlane.xlu0 %334  ;;  %v360_v51 = vmul.f32 0.00390625, %v347_v39 }
  0xdd   : > { %v356_v53 = vmul.f32 0.00390625, %v335_v41 }
  0xde   : > { %v416_v62 = vrot.slane %v360_v51, %v391_v50 }
  0xdf   : > { %v350_v42 = vpop.xlane.xlu1 %349  ;;  %v392_v3 = vrot.slane %v356_v53, %v391_v50 }
  0xe0   : > { %v338_v44 = vpop.xlane.xlu0 %337  ;;  %v361_v55 = vmul.f32 0.00390625, %v350_v42  ;;  %v417_v21 = vsel %vm393_vm1, %v416_v62, %v412_v11  ;;  %v895_v11 = vld [vmem:[#allocation7 + $0xe8] sm:$0xff] }
  0xe1   : > { %v357_v59 = vmul.f32 0.00390625, %v338_v44  ;;  %v394_v27 = vsel %vm393_vm1, %v392_v3, %v387_v19  ;;  %v893_v19 = vld [vmem:[#allocation7 + $0xd8] sm:$0xff] }
  0xe2   : > { %v421_v7 = vrot.slane %v361_v55, %v398_v54  ;;  %v625_v55 = vld [vmem:[%s2110_s4] sm:$0x3] }
  0xe3   : > { %v311_v47 = vpop.xlane.xlu1 %310  ;;  %v399_v16 = vrot.slane %v357_v59, %v398_v54 }
  0xe4   : > { %v308_v49 = vpop.xlane.xlu0 %307  ;;  %v422_v28 = vsel %vm400_vm2, %v421_v7, %v417_v21  ;;  %v519_v37 = vrot.slane %v311_v47, %v391_v50  ;;  %v897_v7 = vld [vmem:[#allocation7 + $0xf8] sm:$0xff]  ;;  %v892_v21 = vld [vmem:[#allocation7 + $0xd0] sm:$0xff] }
  0xe5   : > { %v401_v31 = vsel %vm400_vm2, %v399_v16, %v394_v27  ;;  %v515_v38 = vrot.slane %v308_v49, %v386_v57  ;;  %995 = vmatprep.subr.mxu1 %v897_v7  ;;  %v961_v16 = vld [vmem:[#allocation7 + $0x2f8] sm:$0xff] }
  0xe6   : > { %v957_v27 = vld [vmem:[#allocation7 + $0x2d8] sm:$0xff] }
  0xe7   : > { %v323_v56 = vpop.xlane.xlu1 %322  ;;  %v520_v51 = vsel %vm393_vm1, %v519_v37, %v515_v38  ;;  %v887_v37 = vld [vmem:[#allocation7 + $0xa8] sm:$0xff]  ;;  %v952_v38 = vld [vmem:[#allocation7 + $0x2b0] sm:$0xff]  ;;  %v873_v7 = vld [vmem:[#allocation7 + $0x38] sm:$0xff] }
  0xe8   : > { %v320_v60 = vpop.xlane.xlu0 %319  ;;  %v538_v33 = vrot.slane %v323_v56, %v391_v50  ;;  %v1336_v56 = vld [vmem:[%s2109_s3] ss:$0 sm:$0xff] }
  0xe9   : > { %v534_v34 = vrot.slane %v320_v60, %v386_v57 }
  0xeb   : > { %v353_v10 = vpop.xlane.xlu1 %352  ;;  %v539_v44 = vsel %vm393_vm1, %v538_v33, %v534_v34  ;;  %v889_v33 = vld [vmem:[#allocation7 + $0xb8] sm:$0xff]  ;;  %v954_v34 = vld [vmem:[#allocation7 + $0x2c0] sm:$0xff] }
  0xec   : > { %v362_v17 = vmul.f32 0.00390625, %v353_v10  ;;  %v341_v18 = vpop.xlane.xlu0 %340  ;;  %v896_v10 = vld [vmem:[#allocation7 + $0xf0] sm:$0xff] }
  0xed   : > { %v358_v20 = vmul.f32 0.00390625, %v341_v18  ;;  %v960_v18 = vld [vmem:[#allocation7 + $0x2f0] sm:$0xff] }
  0xee   : > { %v426_v26 = vrot.slane %v362_v17, %v405_v63  ;;  %v894_v17 = vld [vmem:[#allocation7 + $0xe0] sm:$0xff] }
  0xef   : > { %v406_v29 = vrot.slane %v358_v20, %v405_v63  ;;  %v326_v30 = vpop.xlane.xlu1 %325  ;;  %v959_v20 = vld [vmem:[#allocation7 + $0x2e8] sm:$0xff] }
  0xf0   : > { %v314_v35 = vpop.xlane.xlu0 %313  ;;  %v427_v36 = vsel %vm407_vm3, %v426_v26, %v422_v28  ;;  %v543_v39 = vrot.slane %v326_v30, %v398_v54  ;;  %v958_v26 = vld [vmem:[#allocation7 + $0x2e0] sm:$0xff]  ;;  %v891_v28 = vld [vmem:[#allocation7 + $0xc8] sm:$0xff] }
  0xf1   : > { %v408_v40 = vsel %vm407_vm3, %v406_v29, %v401_v31  ;;  %v524_v41 = vrot.slane %v314_v35, %v398_v54  ;;  %v956_v29 = vld [vmem:[#allocation7 + $0x2d0] sm:$0xff]  ;;  %v890_v30 = vld [vmem:[#allocation7 + $0xc0] sm:$0xff]  ;;  %v955_v31 = vld [vmem:[#allocation7 + $0x2c8] sm:$0xff] }
  0xf2   : > { %v429_v42 = vsel %vm428_vm4, %v427_v36, %v408_v40  ;;  %v544_v47 = vsel %vm400_vm2, %v543_v39, %v539_v44  ;;  %v888_v35 = vld [vmem:[#allocation7 + $0xb0] sm:$0xff]  ;;  %v953_v36 = vld [vmem:[#allocation7 + $0x2b8] sm:$0xff]  ;;  %v886_v39 = vld [vmem:[#allocation7 + $0xa0] sm:$0xff] }
  0xf3   : > { %1375 = vmatmul.mubr.msk.f32.vlgmr.msra.gmra.mxu0 %vm430_vm5, %v429_v42  ;;  %v329_v43 = vpop.xlane.xlu1 %328  ;;  %v525_v50 = vsel %vm400_vm2, %v524_v41, %v520_v51  ;;  %v951_v40 = vld [vmem:[#allocation7 + $0x2a8] sm:$0xff]  ;;  %v885_v41 = vld [vmem:[#allocation7 + $0x98] sm:$0xff]  ;;  %v950_v42 = vld [vmem:[#allocation7 + $0x2a0] sm:$0xff] }
  0xf4   : > { %v548_v45 = vrot.slane %v329_v43, %v405_v63  ;;  %v317_v46 = vpop.xlane.xlu0 %316  ;;  %1390 = vmatprep.mubr.msk.f32.mxu0 %vm1598_vm0, %v1597_v32  ;;  %1389 = vmatpush3.msk.msra.mxu0 %vm638_vm6, %v625_v55  ;;  %v884_v43 = vld [vmem:[#allocation7 + $0x90] sm:$0xff]  ;;  %v949_v44 = vld [vmem:[#allocation7 + $0x298] sm:$0xff]  ;;  %v882_v51 = vld [vmem:[#allocation7 + $0x80] sm:$0xff] }
  0xf5   : > { %v529_v49 = vrot.slane %v317_v46, %v405_v63  ;;  %1066 = vmatprep.subr.mxu0 %v961_v16  ;;  %v948_v46 = vld [vmem:[#allocation7 + $0x290] sm:$0xff]  ;;  %v937_v16 = vld [vmem:[#allocation7 + $0x238] sm:$0xff] }
  0xf6   : > { %v549_v52 = vsel %vm407_vm3, %v548_v45, %v544_v47  ;;  %v883_v45 = vld [vmem:[#allocation7 + $0x88] sm:$0xff]  ;;  %v944_v55 = vld [vmem:[#allocation7 + $0x270] sm:$0xff] }
  0xf7   : > { %v530_v53 = vsel %vm407_vm3, %v529_v49, %v525_v50  ;;  %v947_v47 = vld [vmem:[#allocation7 + $0x288] sm:$0xff]  ;;  %v881_v49 = vld [vmem:[#allocation7 + $0x78] sm:$0xff]  ;;  %v946_v50 = vld [vmem:[#allocation7 + $0x280] sm:$0xff] }
  0xf8   : > { %v550_v54 = vsel %vm428_vm4, %v549_v52, %v530_v53  ;;  %v880_v52 = vld [vmem:[#allocation7 + $0x70] sm:$0xff]  ;;  %v945_v53 = vld [vmem:[#allocation7 + $0x278] sm:$0xff] }
  0xf9   : > { %1386 = vmatmul.mubr.msk.f32.vlgmr.msra.gmra.mxu1 %vm430_vm5, %v550_v54  ;;  %v879_v54 = vld [vmem:[#allocation7 + $0x68] sm:$0xff] }
  0xfa   : > { %996 = vmatpush1.msra.mxu1 %v896_v10  ;;  %v938_v10 = vld [vmem:[#allocation7 + $0x240] sm:$0xff] }
  0xfb   : > { %997 = vmatprep.subr.mxu1 %v895_v11  ;;  %v872_v11 = vld [vmem:[#allocation7 + $0x30] sm:$0xff] }
  0xfc   : > { %998 = vmatpush1.msra.mxu1 %v894_v17  ;;  %v871_v17 = vld [vmem:[#allocation7 + $0x28] sm:$0xff] }
  0xfd   : > { %999 = vmatprep.subr.mxu1 %v893_v19  ;;  %v870_v19 = vld [vmem:[#allocation7 + $0x20] sm:$0xff] }
  0xfe   : > { %1000 = vmatpush1.msra.mxu1 %v892_v21  ;;  %v869_v21 = vld [vmem:[#allocation7 + $0x18] sm:$0xff] }
  0xff   : > { %1001 = vmatprep.subr.mxu1 %v891_v28  ;;  %v626_v28 = vld [vmem:[%s2111_s5] sm:$0x1] }
 0x100   : > { %1002 = vmatpush1.msra.mxu1 %v890_v30  ;;  %v1923_v30 = vsub.s32 0, %v1889_v48 }
 0x101   : > { %1003 = vmatprep.subr.mxu1 %v889_v33 }
 0x102   : > { %1004 = vmatpush1.msra.mxu1 %v888_v35 }
 0x103   : > { %1005 = vmatprep.subr.mxu1 %v887_v37 }
 0x104   : > { %1006 = vmatpush1.msra.mxu1 %v886_v39  ;;  %v867_v39 = vld [vmem:[#allocation7 + $0x8] sm:$0xff] }
 0x105   : > { %1007 = vmatprep.subr.mxu1 %v885_v41  ;;  %v866_v41 = vld [vmem:[#allocation7] sm:$0xff] }
 0x106   : > { %1008 = vmatpush1.msra.mxu1 %v884_v43  ;;  %v929_v43 = vld [vmem:[#allocation7 + $0x1f8] sm:$0xff] }
 0x107   : > { %1009 = vmatprep.subr.mxu1 %v883_v45  ;;  %v928_v45 = vld [vmem:[#allocation7 + $0x1f0] sm:$0xff] }
 0x108   : > { %1010 = vmatpush1.msra.mxu1 %v882_v51  ;;  %v927_v51 = vld [vmem:[#allocation7 + $0x1e8] sm:$0xff] }
 0x109   : > { %1011 = vmatprep.subr.mxu1 %v881_v49  ;;  %v926_v49 = vld [vmem:[#allocation7 + $0x1e0] sm:$0xff] }
 0x10a   : > { %1012 = vmatpush1.msra.mxu1 %v880_v52  ;;  %v925_v52 = vld [vmem:[#allocation7 + $0x1d8] sm:$0xff] }
 0x10b   : > { %1013 = vmatprep.subr.mxu1 %v879_v54  ;;  %v924_v54 = vld [vmem:[#allocation7 + $0x1d0] sm:$0xff] }
 0x1b3   : > { %v499_v32 = vpop.f32.mrf.mxu0 }
 0x1b4   : > { %v500_v58 = vadd.f32 %v1336_v56, %v499_v32  ;;  %v878_v32 = vld [vmem:[#allocation7 + $0x60] sm:$0xff] }
 0x1b5   : > { %v1376_v57 = vpop.f32.mrf.mxu0  ;;  %1014 = vmatpush1.msra.mxu1 %v878_v32  ;;  %v923_v32 = vld [vmem:[#allocation7 + $0x1c8] sm:$0xff] }
 0x1b6   : > { %v503_v62 = vmax.f32 %v500_v58, 0.0  ;;  %v877_v57 = vld [vmem:[#allocation7 + $0x58] sm:$0xff]  ;;  %v942_v58 = vld [vmem:[#allocation7 + $0x260] sm:$0xff] }
 0x1b7   : > { %1015 = vmatprep.subr.mxu1 %v877_v57  ;;  %v922_v57 = vld [vmem:[#allocation7 + $0x1c0] sm:$0xff] }
 0x1b9   : > { %v619_v59 = vpop.f32.mrf.mxu1 }
 0x1ba   : > { %v620_v60 = vadd.f32 %v1336_v56, %v619_v59  ;;  %v943_v56 = vld [vmem:[#allocation7 + $0x268] sm:$0xff]  ;;  %v876_v59 = vld [vmem:[#allocation7 + $0x50] sm:$0xff] }
 0x1bb   : > { %v1387_v61 = vpop.f32.mrf.mxu1  ;;  %1016 = vmatpush1.msra.mxu1 %v876_v59 }
 0x1bc   : > { %v623_v63 = vmax.f32 %v620_v60, 0.0  ;;  %v941_v60 = vld [vmem:[#allocation7 + $0x258] sm:$0xff]  ;;  %v875_v61 = vld [vmem:[#allocation7 + $0x48] sm:$0xff] }
 0x1bd   : > { %1017 = vmatprep.subr.mxu1 %v875_v61  ;;  %v987_v61 = vld [vmem:[#allocation7 + $0x3c8] sm:$0xff] }
 0x1be   : > { %v624_v3 = vadd.f32 %v623_v63, %v503_v62  ;;  %v940_v62 = vld [vmem:[#allocation7 + $0x250] sm:$0xff]  ;;  %v874_v63 = vld [vmem:[#allocation7 + $0x40] sm:$0xff] }
 0x1bf   : > { %1018 = vmatpush1.msra.mxu1 %v874_v63  ;;  %v1928_v63 = vsub.s32 1, %v1889_v48 }
 0x1c0   : > { %1391 = vmatmul.mubr.msk.f32.vlgmr.msra.gmra.mxu0 %vm634_vm7, %v624_v3  ;;  %v939_v3 = vld [vmem:[#allocation7 + $0x248] sm:$0xff]  ;;  %1019 = vmatprep.subr.mxu1 %v873_v7  ;;  %v986_v7 = vld [vmem:[#allocation7 + $0x3c0] sm:$0xff] }
 0x1c1   : > { %1067 = vmatpush1.msra.mxu0 %v960_v18  ;;  %v936_v18 = vld [vmem:[#allocation7 + $0x230] sm:$0xff]  ;;  %1020 = vmatpush1.msra.mxu1 %v872_v11  ;;  %v985_v11 = vld [vmem:[#allocation7 + $0x3b8] sm:$0xff] }
 0x1c2   : > { %1068 = vmatprep.subr.mxu0 %v959_v20  ;;  %v935_v20 = vld [vmem:[#allocation7 + $0x228] sm:$0xff]  ;;  %1021 = vmatprep.subr.mxu1 %v871_v17  ;;  %v984_v17 = vld [vmem:[#allocation7 + $0x3b0] sm:$0xff] }
 0x1c3   : > { %1069 = vmatpush1.msra.mxu0 %v958_v26  ;;  %v934_v26 = vld [vmem:[#allocation7 + $0x220] sm:$0xff]  ;;  %1022 = vmatpush1.msra.mxu1 %v870_v19  ;;  %v983_v19 = vld [vmem:[#allocation7 + $0x3a8] sm:$0xff] }
 0x1c4   : > { %1070 = vmatprep.subr.mxu0 %v957_v27  ;;  %v868_v27 = vld [vmem:[#allocation7 + $0x10] sm:$0xff]  ;;  %1023 = vmatprep.subr.mxu1 %v869_v21 }
 0x1c5   : > { %1071 = vmatpush1.msra.mxu0 %v956_v29  ;;  %1024 = vmatpush1.msra.mxu1 %v868_v27  ;;  %v627_v29 = vmul.f32 2.0, %v626_v28  ;;  %v916_v21 = vld [vmem:[#allocation7 + $0x190] sm:$0xff]  ;;  %v915_v27 = vld [vmem:[#allocation7 + $0x188] sm:$0xff]  ;;  %v981_v28 = vld [vmem:[#allocation7 + $0x398] sm:$0xff] }
 0x1c6   : > { %1072 = vmatprep.subr.mxu0 %v955_v31  ;;  %1025 = vmatprep.subr.mxu1 %v867_v39  ;;  %v910_v39 = vld [vmem:[#allocation7 + $0x160] sm:$0xff] }
 0x1c7   : > { %1073 = vmatpush1.msra.mxu0 %v954_v34  ;;  %v632_v31 = vrot.slane %v627_v29, %v1923_v30  ;;  %1026 = vmatpush1.msra.mxu1 %v866_v41  ;;  %v914_v29 = vld [vmem:[#allocation7 + $0x180] sm:$0xff]  ;;  %v909_v41 = vld [vmem:[#allocation7 + $0x158] sm:$0xff] }
 0x1c8   : > { %1074 = vmatprep.subr.mxu0 %v953_v36  ;;  %1027 = vmatprep.subr.mxu1 %v929_v43  ;;  %v908_v43 = vld [vmem:[#allocation7 + $0x150] sm:$0xff] }
 0x1c9   : > { %1075 = vmatpush1.msra.mxu0 %v952_v38  ;;  %1028 = vmatpush2.msra.mxu1 %v928_v45  ;;  %v907_v45 = vld [vmem:[#allocation7 + $0x148] sm:$0xff] }
 0x1ca   : > { %1076 = vmatprep.subr.mxu0 %v951_v40  ;;  %v933_v40 = vld [vmem:[#allocation7 + $0x218] sm:$0xff]  ;;  %1029 = vmatprep.subr.mxu1 %v927_v51  ;;  %v906_v51 = vld [vmem:[#allocation7 + $0x140] sm:$0xff] }
 0x1cb   : > { %1077 = vmatpush1.msra.mxu0 %v950_v42  ;;  %v932_v42 = vld [vmem:[#allocation7 + $0x210] sm:$0xff]  ;;  %1030 = vmatpush2.msra.mxu1 %v926_v49  ;;  %v905_v49 = vld [vmem:[#allocation7 + $0x138] sm:$0xff] }
 0x1cc   : > { %1078 = vmatprep.subr.mxu0 %v949_v44  ;;  %v931_v44 = vld [vmem:[#allocation7 + $0x208] sm:$0xff]  ;;  %1031 = vmatprep.subr.mxu1 %v925_v52  ;;  %v904_v52 = vld [vmem:[#allocation7 + $0x130] sm:$0xff] }
 0x1cd   : > { %1079 = vmatpush1.msra.mxu0 %v948_v46  ;;  %v930_v46 = vld [vmem:[#allocation7 + $0x200] sm:$0xff]  ;;  %1032 = vmatpush2.msra.mxu1 %v924_v54  ;;  %v903_v54 = vld [vmem:[#allocation7 + $0x128] sm:$0xff] }
 0x1ce   : > { %1080 = vmatprep.subr.mxu0 %v947_v47  ;;  %v993_v47 = vld [vmem:[#allocation7 + $0x3f8] sm:$0xff]  ;;  %1033 = vmatprep.subr.mxu1 %v923_v32  ;;  %v902_v32 = vld [vmem:[#allocation7 + $0x120] sm:$0xff] }
 0x1cf   : > { %1081 = vmatpush1.msra.mxu0 %v946_v50  ;;  %v992_v50 = vld [vmem:[#allocation7 + $0x3f0] sm:$0xff]  ;;  %1034 = vmatpush2.msra.mxu1 %v922_v57  ;;  %v901_v57 = vld [vmem:[#allocation7 + $0x118] sm:$0xff] }
 0x1d0   : > { %1082 = vmatprep.subr.mxu0 %v945_v53  ;;  %v991_v53 = vld [vmem:[#allocation7 + $0x3e8] sm:$0xff] }
 0x1d1   : > { %1083 = vmatpush1.msra.mxu0 %v944_v55  ;;  %v990_v55 = vld [vmem:[#allocation7 + $0x3e0] sm:$0xff] }
 0x1d2   : > { %1084 = vmatprep.subr.mxu0 %v943_v56  ;;  %v989_v56 = vld [vmem:[#allocation7 + $0x3d8] sm:$0xff] }
 0x1d3   : > { %1085 = vmatpush1.msra.mxu0 %v942_v58  ;;  %v988_v58 = vld [vmem:[#allocation7 + $0x3d0] sm:$0xff] }
 0x1d4   : > { %1086 = vmatprep.subr.mxu0 %v941_v60  ;;  %v921_v60 = vld [vmem:[#allocation7 + $0x1b8] sm:$0xff] }
 0x1d5   : > { %1087 = vmatpush1.msra.mxu0 %v940_v62  ;;  %1035 = vmatprep.subr.mxu1 %v921_v60  ;;  %v966_v60 = vld [vmem:[#allocation7 + $0x320] sm:$0xff] }
 0x1d6   : > { %1088 = vmatprep.subr.mxu0 %v939_v3  ;;  %v920_v3 = vld [vmem:[#allocation7 + $0x1b0] sm:$0xff] }
 0x1d7   : > { %1089 = vmatpush1.msra.mxu0 %v938_v10  ;;  %1036 = vmatpush2.msra.mxu1 %v920_v3  ;;  %v919_v10 = vld [vmem:[#allocation7 + $0x1a8] sm:$0xff]  ;;  %v898_v3 = vld [vmem:[#allocation7 + $0x100] sm:$0xff] }
 0x1d8   : > { %1090 = vmatprep.subr.mxu0 %v937_v16  ;;  %v918_v16 = vld [vmem:[#allocation7 + $0x1a0] sm:$0xff]  ;;  %1037 = vmatprep.subr.mxu1 %v919_v10  ;;  %v963_v10 = vld [vmem:[#allocation7 + $0x308] sm:$0xff] }
 0x1d9   : > { %1091 = vmatpush1.msra.mxu0 %v936_v18  ;;  %v917_v18 = vld [vmem:[#allocation7 + $0x198] sm:$0xff]  ;;  %1038 = vmatpush2.msra.mxu1 %v918_v16 }
 0x1da   : > { %1092 = vmatprep.subr.mxu0 %v935_v20  ;;  %1039 = vmatprep.subr.mxu1 %v917_v18 }
 0x1db   : > { %1093 = vmatpush1.msra.mxu0 %v934_v26  ;;  %v982_v26 = vld [vmem:[#allocation7 + $0x3a0] sm:$0xff]  ;;  %1040 = vmatpush2.msra.mxu1 %v916_v21 }
 0x1dc   : > { %1094 = vmatprep.subr.mxu0 %v933_v40  ;;  %1041 = vmatprep.subr.mxu1 %v915_v27  ;;  %v976_v40 = vld [vmem:[#allocation7 + $0x370] sm:$0xff] }
 0x1dd   : > { %1095 = vmatpush1.msra.mxu0 %v932_v42  ;;  %1042 = vmatpush2.msra.mxu1 %v914_v29  ;;  %v975_v42 = vld [vmem:[#allocation7 + $0x368] sm:$0xff] }
 0x1de   : > { %1096 = vmatprep.subr.mxu0 %v931_v44  ;;  %v974_v44 = vld [vmem:[#allocation7 + $0x360] sm:$0xff] }
 0x1df   : > { %1097 = vmatpush1.msra.mxu0 %v930_v46  ;;  %v973_v46 = vld [vmem:[#allocation7 + $0x358] sm:$0xff] }
 0x1e0   : > { %1098 = vmatprep.subr.mxu0 %v993_v47  ;;  %v972_v47 = vld [vmem:[#allocation7 + $0x350] sm:$0xff] }
 0x1e1   : > { %1099 = vmatpush2.msra.mxu0 %v992_v50  ;;  %v971_v50 = vld [vmem:[#allocation7 + $0x348] sm:$0xff] }
 0x1e2   : > { %1100 = vmatprep.subr.mxu0 %v991_v53  ;;  %v970_v53 = vld [vmem:[#allocation7 + $0x340] sm:$0xff] }
 0x1e3   : > { %1101 = vmatpush2.msra.mxu0 %v990_v55  ;;  %v969_v55 = vld [vmem:[#allocation7 + $0x338] sm:$0xff] }
 0x1e4   : > { %1102 = vmatprep.subr.mxu0 %v989_v56  ;;  %v968_v56 = vld [vmem:[#allocation7 + $0x330] sm:$0xff] }
 0x1e5   : > { %1103 = vmatpush2.msra.mxu0 %v988_v58  ;;  %v967_v58 = vld [vmem:[#allocation7 + $0x328] sm:$0xff] }
 0x1e6   : > { %1104 = vmatprep.subr.mxu0 %v987_v61  ;;  %v899_v61 = vld [vmem:[#allocation7 + $0x108] sm:$0xff] }
 0x1e7   : > { %1105 = vmatpush2.msra.mxu0 %v986_v7  ;;  %v964_v7 = vld [vmem:[#allocation7 + $0x310] sm:$0xff] }
 0x1e8   : > { %1106 = vmatprep.subr.mxu0 %v985_v11  ;;  %v962_v11 = vld [vmem:[#allocation7 + $0x300] sm:$0xff] }
 0x1e9   : > { %1107 = vmatpush2.msra.mxu0 %v984_v17 }
 0x1ea   : > { %1108 = vmatprep.subr.mxu0 %v983_v19 }
 0x1eb   : > { %1109 = vmatpush2.msra.mxu0 %v982_v26 }
 0x1ec   : > { %1110 = vmatprep.subr.mxu0 %v981_v28 }
 0x280   : > { %v708_v33 = vpop.f32.mrf.mxu0 }
 0x281   : > { %v709_v34 = vadd.f32 %v708_v33, %v632_v31  ;;  %v980_v31 = vld [vmem:[#allocation7 + $0x390] sm:$0xff]  ;;  %v913_v33 = vld [vmem:[#allocation7 + $0x178] sm:$0xff] }
 0x282   : > { %v1392_v35 = vpop.f32.mrf.mxu0  ;;  %1111 = vmatpush2.msra.mxu0 %v980_v31  ;;  %1043 = vmatprep.subr.mxu1 %v913_v33 }
 0x283   : > { %v1341_v36 = vmul.f32 -1.442695, %v709_v34  ;;  %v979_v34 = vld [vmem:[#allocation7 + $0x388] sm:$0xff]  ;;  %v912_v35 = vld [vmem:[#allocation7 + $0x170] sm:$0xff] }
 0x284   : > { %1112 = vmatprep.subr.mxu0 %v979_v34  ;;  %1044 = vmatpush2.msra.mxu1 %v912_v35 }
 0x285   : > { %1457 = vpow2.f32 %v1341_v36  ;;  %v978_v36 = vld [vmem:[#allocation7 + $0x380] sm:$0xff] }
 0x286   : > { %1113 = vmatpush2.msra.mxu0 %v978_v36 }
 0x292   : > { %v1458_v37 = vpop.eup %1457 }
 0x293   : > { %v715_v38 = vadd.f32 1.0, %v1458_v37  ;;  %v911_v37 = vld [vmem:[#allocation7 + $0x168] sm:$0xff] }
 0x294   : > { %1045 = vmatprep.subr.mxu1 %v911_v37 }
 0x295   : > { %1459 = vrcp.f32 %v715_v38  ;;  %v977_v38 = vld [vmem:[#allocation7 + $0x378] sm:$0xff]  ;;  %1046 = vmatpush2.msra.mxu1 %v910_v39 }
 0x296   : > { %1114 = vmatprep.subr.mxu0 %v977_v38  ;;  %1047 = vmatprep.subr.mxu1 %v909_v41 }
 0x297   : > { %1115 = vmatpush2.msra.mxu0 %v976_v40  ;;  %1048 = vmatpush2.msra.mxu1 %v908_v43 }
 0x298   : > { %1116 = vmatprep.subr.mxu0 %v975_v42  ;;  %1049 = vmatprep.subr.mxu1 %v907_v45 }
 0x299   : > { %1117 = vmatpush2.msra.mxu0 %v974_v44  ;;  %1050 = vmatpush2.msra.mxu1 %v906_v51 }
 0x29a   : > { %1118 = vmatprep.subr.mxu0 %v973_v46  ;;  %1051 = vmatprep.subr.mxu1 %v905_v49 }
 0x29b   : > { %1119 = vmatpush2.msra.mxu0 %v972_v47  ;;  %1052 = vmatpush2.msra.mxu1 %v904_v52 }
 0x29c   : > { %1120 = vmatprep.subr.mxu0 %v971_v50  ;;  %1053 = vmatprep.subr.mxu1 %v903_v54 }
 0x29d   : > { %1121 = vmatpush2.msra.mxu0 %v970_v53  ;;  %1054 = vmatpush2.msra.mxu1 %v902_v32 }
 0x29e   : > { %1122 = vmatprep.subr.mxu0 %v969_v55  ;;  %1055 = vmatprep.subr.mxu1 %v901_v57 }
 0x29f   : > { %1123 = vmatpush2.msra.mxu0 %v968_v56 }
 0x2a0   : > { %1124 = vmatprep.subr.mxu0 %v967_v58 }
 0x2a1   : > { %1125 = vmatpush2.msra.mxu0 %v966_v60 }
 0x2a2   : > { %v1460_v59 = vpop.eup %1459 }
 0x2a3   : > { %v721_v62 = vrot.slane %v1460_v59, %v1923_v30  ;;  %v740_v20 = vrot.slane %v1460_v59, %v1928_v63  ;;  %v900_v59 = vld [vmem:[#allocation7 + $0x110] sm:$0xff] }
 0x2a4   : > { %1056 = vmatpush2.msra.mxu1 %v900_v59 }
 0x2a5   : > { %727 = vbcast.lane.b32.xlu1 %v721_v62, 264  ;;  %723 = vbcast.lane.b32.xlu0 %v721_v62, 256 }
 0x2a6   : > { %1057 = vmatprep.subr.mxu1 %v899_v61 }
 0x2a7   : > { %1058 = vmatpush2.msra.mxu1 %v898_v3 }
 0x2a9   : > { %742 = vbcast.lane.b32.xlu1 %v740_v20, 256  ;;  %731 = vbcast.lane.b32.xlu0 %v721_v62, 272 }
 0x2ad   : > { %746 = vbcast.lane.b32.xlu1 %v740_v20, 264  ;;  %735 = vbcast.lane.b32.xlu0 %v721_v62, 280  ;;  %v965_v62 = vld [vmem:[#allocation7 + $0x318] sm:$0xff] }
 0x2ae   : > { %1126 = vmatprep.subr.mxu0 %v965_v62 }
 0x2af   : > { %1127 = vmatpush2.msra.mxu0 %v964_v7 }
 0x2b0   : > { %1128 = vmatprep.subr.mxu0 %v963_v10 }
 0x2b1   : > { %750 = vbcast.lane.b32.xlu1 %v740_v20, 272  ;;  %1129 = vmatpush2.msra.mxu0 %v962_v11 }
 0x2b5   : > { %754 = vbcast.lane.b32.xlu1 %v740_v20, 280 }
 0x317   : > { %v728_v16 = vpop.permute.xlu1 %727  ;;  %v724_v17 = vpop.permute.xlu0 %723 }
 0x318   : > { %v1932_v18 = vmul.f32 %v728_v16, %v1807_v8  ;;  %v1935_v19 = vmul.f32 %v728_v16, %v1810_v9  ;;  %v1938_v20 = vmul.f32 %v724_v17, %v1791_v2  ;;  %v1941_v21 = vmul.f32 %v724_v17, %v1796_v4 }
 0x31a   : > { %v772_v8 = vmax.f32 %v1938_v20, %v1932_v18  ;;  %v781_v9 = vmax.f32 %v1941_v21, %v1935_v19  ;;  %v808_v2 = vadd.f32 %v1932_v18, %v1938_v20  ;;  %v817_v4 = vadd.f32 %v1935_v19, %v1941_v21 }
 0x31b   : > { %v743_v26 = vpop.permute.xlu1 %742  ;;  %v732_v27 = vpop.permute.xlu0 %731 }
 0x31c   : > { %v1944_v28 = vmul.f32 %v732_v27, %v1823_v14  ;;  %v1947_v29 = vmul.f32 %v732_v27, %v1826_v15 }
 0x31e   : > { %v773_v36 = vmax.f32 %v772_v8, %v1944_v28  ;;  %v782_v37 = vmax.f32 %v781_v9, %v1947_v29  ;;  %v809_v38 = vadd.f32 %v808_v2, %v1944_v28  ;;  %v818_v39 = vadd.f32 %v817_v4, %v1947_v29 }
 0x31f   : > { %v747_v31 = vpop.permute.xlu1 %746  ;;  %v736_v33 = vpop.permute.xlu0 %735 }
 0x320   : > { %v1958_v14 = vmul.f32 %v747_v31, %v1799_v5  ;;  %v1961_v15 = vmul.f32 %v747_v31, %v1802_v6  ;;  %v1964_v34 = vmul.f32 %v736_v33, %v1847_v24  ;;  %v1967_v35 = vmul.f32 %v736_v33, %v1850_v25 }
 0x321   : > { %v1974_v5 = vmul.f32 %v743_v26, %v1785_v0  ;;  %v1977_v6 = vmul.f32 %v743_v26, %v1788_v1 }
 0x322   : > { %v774_v24 = vmax.f32 %v773_v36, %v1964_v34  ;;  %v783_v40 = vmax.f32 %v782_v37, %v1967_v35  ;;  %v810_v25 = vadd.f32 %v809_v38, %v1964_v34  ;;  %v819_v41 = vadd.f32 %v818_v39, %v1967_v35 }
 0x323   : > { %v751_v42 = vpop.permute.xlu1 %750  ;;  %v790_v43 = vmax.f32 %v1974_v5, %v1958_v14  ;;  %v799_v44 = vmax.f32 %v1977_v6, %v1961_v15  ;;  %v826_v49 = vadd.f32 %v1958_v14, %v1974_v5  ;;  %v835_v50 = vadd.f32 %v1961_v15, %v1977_v6 }
 0x324   : > { %v1988_v0 = vmul.f32 %v751_v42, %v1817_v12  ;;  %v1991_v1 = vmul.f32 %v751_v42, %v1820_v13  ;;  %v775_v45 = vrot.slane %v774_v24, 4  ;;  %v784_v46 = vrot.slane %v783_v40, 4 }
 0x325   : > { %v811_v51 = vrot.slane %v810_v25, 4  ;;  %v820_v47 = vrot.slane %v819_v41, 4 }
 0x326   : > { %v791_v52 = vmax.f32 %v790_v43, %v1988_v0  ;;  %v800_v53 = vmax.f32 %v799_v44, %v1991_v1  ;;  %v776_v54 = vmax.f32 %v774_v24, %v775_v45  ;;  %v785_v12 = vmax.f32 %v783_v40, %v784_v46 }
 0x327   : > { %v812_v55 = vadd.f32 %v811_v51, %v810_v25  ;;  %v821_v32 = vadd.f32 %v820_v47, %v819_v41  ;;  %v755_v13 = vpop.permute.xlu1 %754  ;;  %v827_v56 = vadd.f32 %v826_v49, %v1988_v0  ;;  %v836_v57 = vadd.f32 %v835_v50, %v1991_v1 }
 0x328   : > { %v2002_v58 = vmul.f32 %v755_v13, %v1841_v22  ;;  %v2005_v59 = vmul.f32 %v755_v13, %v1844_v23  ;;  %v777_v60 = vrot.slane %v776_v54, 2  ;;  %v786_v61 = vrot.slane %v785_v12, 2 }
 0x329   : > { %v813_v62 = vrot.slane %v812_v55, 2  ;;  %v822_v3 = vrot.slane %v821_v32, 2 }
 0x32a   : > { %v792_v7 = vmax.f32 %v791_v52, %v2002_v58  ;;  %v801_v10 = vmax.f32 %v800_v53, %v2005_v59  ;;  %v828_v11 = vadd.f32 %v827_v56, %v2002_v58  ;;  %v837_v16 = vadd.f32 %v836_v57, %v2005_v59 }
 0x32b   : > { %v814_v17 = vadd.f32 %v813_v62, %v812_v55  ;;  %v823_v26 = vadd.f32 %v822_v3, %v821_v32  ;;  %v778_v23 = vmax.f32 %v776_v54, %v777_v60  ;;  %v787_v2 = vmax.f32 %v785_v12, %v786_v61 }
 0x32c   : > { %v793_v27 = vrot.slane %v792_v7, 4  ;;  %v802_v22 = vrot.slane %v801_v10, 4  ;;  %v829_v8 = vrot.slane %v828_v11, 4  ;;  %v838_v9 = vrot.slane %v837_v16, 4 }
 0x32d   : > { %v824_v37 = vrot.slane %v823_v26, 1  ;;  %v815_v38 = vrot.slane %v814_v17, 1  ;;  %v788_v41 = vrot.slane %v787_v2, 1  ;;  %v779_v42 = vrot.slane %v778_v23, 1 }
 0x32e   : > { %v794_v4 = vmax.f32 %v792_v7, %v793_v27  ;;  %v803_v31 = vmax.f32 %v801_v10, %v802_v22  ;;  %v830_v33 = vadd.f32 %v829_v8, %v828_v11  ;;  %v839_v36 = vadd.f32 %v838_v9, %v837_v16 }
 0x32f   : > { %v825_v51 = vadd.f32 %v824_v37, %v823_v26  ;;  %v816_v47 = vadd.f32 %v815_v38, %v814_v17  ;;  %v789_v54 = vmax.f32 %v787_v2, %v788_v41  ;;  %v780_v12 = vmax.f32 %v778_v23, %v779_v42 }
 0x330   : > { %v795_v39 = vrot.slane %v794_v4, 2  ;;  %v804_v24 = vrot.slane %v803_v31, 2  ;;  %v831_v40 = vrot.slane %v830_v33, 2  ;;  %v840_v25 = vrot.slane %v839_v36, 2 }
 0x331   : > { %v846_v57 = vmul.f32 0.03125, %v825_v51  ;;  %v845_v60 = vmul.f32 0.03125, %v816_v47  ;;  %v994_v16 = vstv %s849_s10 }
 0x332   : > { %v796_v43 = vmax.f32 %v794_v4, %v795_v39  ;;  %v832_v44 = vadd.f32 %v831_v40, %v830_v33  ;;  %v805_v45 = vmax.f32 %v803_v31, %v804_v24  ;;  %v841_v46 = vadd.f32 %v840_v25, %v839_v36 }
 0x333   : > { %v1599_v39 = vmov 1966171168  }
 0x334   : > { %v806_v49 = vrot.slane %v805_v45, 1  ;;  %v797_v50 = vrot.slane %v796_v43, 1  ;;  %v842_v52 = vrot.slane %v841_v46, 1  ;;  %v833_v53 = vrot.slane %v832_v44, 1 }
 0x335   : > { %v1153_v24 = vunpack.c.l.s4 %v1599_v39 }
 0x336   : > { %v807_v55 = vmax.f32 %v805_v45, %v806_v49  ;;  %v798_v32 = vmax.f32 %v796_v43, %v797_v50  ;;  %v843_v13 = vadd.f32 %v842_v52, %v841_v46  ;;  %v834_v56 = vadd.f32 %v833_v53, %v832_v44 }
 0x337   : > { %v1154_v40 = vunpack.c.0.s8 %v1153_v24 }
 0x338   : > { %v855_v61 = vsel %vm428_vm4, %v807_v55, %v789_v54  ;;  %v854_v62 = vsel %vm428_vm4, %v798_v32, %v780_v12  ;;  %v848_v3 = vmul.f32 0.03125, %v843_v13  ;;  %v847_v7 = vmul.f32 0.03125, %v834_v56 }
 0x339   : > { %1059 = vmatprep.mubr.f32.mxu1 %v855_v61  ;;  %v1157_v41 = vsub.s32 %v1154_v40, %v1889_v48 }
 0x33a   : > { %1060 = vmatmul.mubr.f32.vlgmr.msra.gmra.mxu1 %v854_v62  ;;  %v863_v10 = vsel %vm428_vm4, %v848_v3, %v846_v57  ;;  %v862_v11 = vsel %vm428_vm4, %v847_v7, %v845_v60 }
 0x33b   : > { %1130 = vmatprep.mubr.f32.mxu0 %v863_v10 }
 0x33c   : > { %1131 = vmatmul.mubr.f32.vlgmr.msra.gmra.mxu0 %v862_v11 }
 0x3fa   : > { %v1061_v17 = vpop.f32.mrf.mxu1 }
 0x3fb   : > { %v1062_v26 = vadd.f32 %v1061_v17, %v994_v16 }
 0x3fc   : > { %v1063_v27 = vpop.f32.mrf.mxu1  ;;  %v1132_v22 = vpop.f32.mrf.mxu0 }
 0x3fd   : > { %v1064_v8 = vadd.f32 %v1063_v27, %v994_v16  ;;  %v1133_v9 = vadd.f32 %v1132_v22, %v1062_v26 }
 0x3fe   : > { %v1134_v23 = vpop.f32.mrf.mxu0 }
 0x3ff   : > { %v1342_v2 = vmul.f32 -1.442695, %v1133_v9  ;;  %v1135_v4 = vadd.f32 %v1134_v23, %v1064_v8 }
 0x401   : > { %1461 = vpow2.f32 %v1342_v2  ;;  %v1343_v31 = vmul.f32 -1.442695, %v1135_v4 }
 0x403   : > { %1463 = vpow2.f32 %v1343_v31 }
 0x40e   : > { %v1462_v33 = vpop.eup %1461 }
 0x40f   : > { %v1143_v36 = vadd.f32 1.0, %v1462_v33 }
 0x410   : > { %v1464_v37 = vpop.eup %1463 }
 0x411   : > { %v1144_v38 = vadd.f32 1.0, %v1464_v37  ;;  %1465 = vrcp.f32 %v1143_v36 }
 0x413   : > { %1467 = vrcp.f32 %v1144_v38 }
 0x41e   : > { %v1466_v25 = vpop.eup %1465 }
 0x420   : > { %v1468_v42 = vpop.eup %1467 }
 0x421   : > { %v1151_v43 = vcombine.low %v1466_v25, %v1468_v42 }
 0x423   : > { %v1158_v44 = vrot.slane %v1151_v43, %v1157_v41 }
 0x425   : > { %v1159_v45 = vcombine.high %v1158_v44, %v1158_v44  ;;  %v1166_v46 = vrot.slane %v1158_v44, %v1157_v41 }
 0x427   : > { %v1173_v51 = vrot.slane %v1159_v45, %v1157_v41  ;;  %v1177_v47 = vrot.slane %v1166_v46, %v1923_v30  ;;  %v1181_v49 = vrot.slane %v1166_v46, %v1928_v63 }
 0x429   : > { %v1185_v50 = vrot.slane %v1173_v51, %v1923_v30  ;;  %v1189_v52 = vrot.slane %v1173_v51, %v1928_v63  ;;  %v1194_v53 = vmul.f32 %v1177_v47, %v1938_v20  ;;  %v1195_v54 = vmul.f32 %v1181_v49, %v1941_v21 }
 0x42a   : > { %v1196_v48 = vmul.f32 %v1177_v47, %v1932_v18  ;;  %v1197_v30 = vmul.f32 %v1181_v49, %v1935_v19  ;;  %v1198_v63 = vmul.f32 %v1177_v47, %v1944_v28  ;;  %v1199_v20 = vmul.f32 %v1181_v49, %v1947_v29 }
 0x42b   : > { %v1200_v21 = vmul.f32 %v1177_v47, %v1964_v34  ;;  %v1201_v12 = vmul.f32 %v1181_v49, %v1967_v35  ;;  %v1202_v55 = vmul.f32 %v1185_v50, %v1974_v5  ;;  %v1203_v32 = vmul.f32 %v1189_v52, %v1977_v6  ;;  %1210 = vst [vmem:[%s2025_s15] sm:$0xff] %v1194_v53 }
 0x42c   : > { %1211 = vst [vmem:[%s2025_s15 + $0x8] sm:$0xff] %v1195_v54  ;;  %v1204_v18 = vmul.f32 %v1185_v50, %v1958_v14  ;;  %v1205_v19 = vmul.f32 %v1189_v52, %v1961_v15  ;;  %v1206_v28 = vmul.f32 %v1185_v50, %v1988_v0  ;;  %v1207_v29 = vmul.f32 %v1189_v52, %v1991_v1 }
 0x42d   : > { %1212 = vst [vmem:[%s2025_s15 + $0x10] sm:$0xff] %v1196_v48  ;;  %1213 = vst [vmem:[%s2025_s15 + $0x18] sm:$0xff] %v1197_v30  ;;  %v1208_v14 = vmul.f32 %v1185_v50, %v2002_v58  ;;  %v1209_v15 = vmul.f32 %v1189_v52, %v2005_v59 }
 0x42e   : > { %1214 = vst [vmem:[%s2025_s15 + $0x20] sm:$0xff] %v1198_v63  ;;  %1215 = vst [vmem:[%s2025_s15 + $0x28] sm:$0xff] %v1199_v20 }
 0x42f   : > { %1216 = vst [vmem:[%s2025_s15 + $0x30] sm:$0xff] %v1200_v21  ;;  %1217 = vst [vmem:[%s2025_s15 + $0x38] sm:$0xff] %v1201_v12 }
 0x430   : > { %1218 = vst [vmem:[%s2025_s15 + $0x40] sm:$0xff] %v1202_v55  ;;  %1219 = vst [vmem:[%s2025_s15 + $0x48] sm:$0xff] %v1203_v32 }
 0x431   : > { %1220 = vst [vmem:[%s2025_s15 + $0x50] sm:$0xff] %v1204_v18  ;;  %1221 = vst [vmem:[%s2025_s15 + $0x58] sm:$0xff] %v1205_v19 }
 0x432   : > { %1222 = vst [vmem:[%s2025_s15 + $0x60] sm:$0xff] %v1206_v28  ;;  %1223 = vst [vmem:[%s2025_s15 + $0x68] sm:$0xff] %v1207_v29 }
 0x433   : > { %1224 = vst [vmem:[%s2025_s15 + $0x70] sm:$0xff] %v1208_v14  ;;  %1225 = vst [vmem:[%s2025_s15 + $0x78] sm:$0xff] %v1209_v15 }
 0x434   : > { %1536 = shalt.err (!%p1533_p0)
}
 0x435   : > { %s1537_s30 = scalar_lea.hbm %s2049_s13, 2048  ;;  %s1541_s10 = scalar_lea.hbm %s2113_s7, 4096 }
 0x436   : > { %p1538_p5 = scmp.ne.s32.totalorder %s2049_s13, %s1537_s30  ;;  %p1542_p4 = scmp.lt.s32.totalorder %s2049_s13, %s2113_s7 }
 0x437   : > { %p1543_p6 = scmp.lt.s32.totalorder %s1541_s10, %s1537_s30 }
 0x438   : > { %p1539_p2 = pnand %p1538_p5, %p2133_p11 }
 0x439   : > { %p1544_p8 = por %p1543_p6, %p1542_p4 }
 0x43a   : > { %p1540_p1 = pneg %p1539_p2 }
 0x43c   : > { %p1545_p3 = pnand %p1544_p8, %p1540_p1 }
 0x43e   : > { %1548 = shalt.err (!%p1545_p3)
}
 0x43f   : > { %s1601_s0 = smov 256   ;;  %s1602_s19 = smov 16  }
 0x440   : > { %1399 = dma.vmem_to_hbm [thread:$0]  (%p2133_p11), %s2051_s20, 2048, %s2049_s13, %s1227_s12, %s1601_s0, %s1601_s0, %s1602_s19  }
 0x441 PF: > { %s1256_s24 = sand.u32 1, %s1579_s26   ;;  %p2134_p7 = scmp.ne.s32.totalorder %s2121_s9, 0 }
 0x442   : > { %p2135_p9 = scmp.ge.s32.totalorder %s1591_s29, 2  ;;  %s1257_s25 = scalar_lea.sflag [#allocation6], %s1256_s24 }
 0x444   : > { %p1410_p10 = pnand %p2135_p9, %p2134_p7 }
 0x446   : > { %p1411_p12 = pneg %p1410_p10 }
 0x448   : > { %1574 = dma.done.wait (%p1411_p12), %s1257_s25, 2048  }
 0x449   : > { %1576 = vsyncadd (%p1411_p12), %s1257_s25, 4294965248  ;;  %p22_p13 = scmp.ge.s32.totalorder %s1700_s14, 4   ;;  %s2136_s26 = smov %s1583_s27 }
 0x44a   : > { %s2137_s27 = smov %s1587_s28  ;;  %s2138_s28 = smov %s1720_s22 }
 0x44b   : > { %s2139_s29 = smov %s1700_s14  ;;  %24 = sbr.rel (!%p22_p13) target bundleno = 8 (0x8), region = 93 }
 0x450   :  { %1262 = vsyncpa [#allocation5], 1 }
 0x451   :  { %1264 = vsyncpa [#allocation5 + $0x1], 1 }
 0x452   :  { %1265 = vsyncpa [#allocation8], 1 }
 0x453   :  { %1266 = vsyncpa [#allocation6], 1 }
 0x454   :  { %1268 = vsyncpa [#allocation6 + $0x1], 1 }

</bundles_post_ra>
